<compile_context>
chip_gen: v7x
topology: tpu7x:2x2x1
jax: 0.10.0
libtpu: 0.0.40
codegen_flags: <defaults>
</compile_context>

<pallas_src>
import functools

import jax
import jax.numpy as jnp
from jax import lax
from jax.experimental import pallas as pl
from jax.experimental.pallas import tpu as pltpu


def seblock_kernel(x_ref, w_ref, posb_ref, o_ref, *, matmul_dtype=None):
    # x_ref:    (1, TM, E_pad)  row tile of one batch element (x dtype)
    # w_ref:    (E_pad, E_pad)  qkv weight, already (in, out) and final dtype
    # posb_ref: (1, TM, E_pad)  position embeddings + bias, in x's dtype
    # o_ref:    (1, TM, E_pad)
    x = x_ref[0]                                    # (TM, E_pad)
    w = w_ref[...]                                  # (K, N) -- no per-step cast

    xm = x.astype(matmul_dtype) if matmul_dtype is not None else x

    # y = x @ W^T  (weight was pre-transposed to (in, out) in the wrapper),
    # f32 accumulation on the MXU.
    lin = lax.dot_general(
        xm, w,
        dimension_numbers=(((1,), (0,)), ((), ())),
        preferred_element_type=jnp.float32)         # (TM, E_pad)

    out = lin + posb_ref[0].astype(jnp.float32)     # bias already folded in
    # dropout(p=0) is identity -> nothing to do.
    gated = x.astype(jnp.float32) * out             # elementwise gate in f32
    o_ref[0] = gated.astype(o_ref.dtype)


def _round_up(n, m):
    return ((n + m - 1) // m) * m


def seblock_forward(x, w_qkv, b_qkv, pos_emb, *, tm=512, matmul_dtype=None,
                    vmem_budget_bytes=32 * 1024 * 1024):
    """x: (B, S, E); w_qkv: (E, E) PyTorch layout (out, in); b_qkv: (E,);
    pos_emb: (1, S, E) or (S, E). Returns (B, S, E)."""
    B, S, E = x.shape
    pos_emb = pos_emb.reshape(1, S, E)

    # Fold the Linear bias into the position embedding once (in f32), then
    # store in x's dtype so the posb stream is never wider than x's.
    posb = (pos_emb.astype(jnp.float32)
            + b_qkv.reshape(1, 1, E).astype(jnp.float32)).astype(x.dtype)

    # One-time transpose to (in, out): MXU-native (K, N) RHS layout.
    # Pre-cast once here when a reduced matmul dtype is requested.
    w_t = jnp.swapaxes(w_qkv, 0, 1)
    if matmul_dtype is not None:
        w_t = w_t.astype(matmul_dtype)

    # Lane-dense layout: pad the embedding dim to a multiple of 128 (only if
    # actually misaligned).  Rows are NOT padded: Pallas masks the ragged tile.
    E_pad = _round_up(E, 128)
    TM = _round_up(min(tm, _round_up(S, 8)), 8)

    x_bytes = x.dtype.itemsize
    w_bytes = w_t.dtype.itemsize
    w_vmem_bytes = E_pad * E_pad * w_bytes

    # Single-buffer the resident weight when the (never-used) second buffer
    # would meaningfully eat into the v7x 64 MiB VMEM budget.
    w_pipeline_mode = pl.Buffered(1) if w_vmem_bytes >= (1 << 20) else None
    w_buffers = 1 if w_pipeline_mode is not None else 2

    def vmem_estimate(tm_):
        tiles = 2 * 3 * tm_ * E_pad * x_bytes        # double-buffered x/posb/out
        return tiles + w_buffers * w_vmem_bytes

    # Shrink TM until the working set fits the budget (fits every generation).
    while TM > 8 and vmem_estimate(TM) > vmem_budget_bytes - (4 << 20):
        TM = max(8, _round_up(TM // 2, 8))

    # Pad only the embedding (lane) dim, and only when misaligned -- aligned
    # shapes skip the extra HBM read+write of the activation tensor entirely.
    if E_pad != E:
        x_in = jnp.pad(x, ((0, 0), (0, 0), (0, E_pad - E)))
        posb_in = jnp.pad(posb, ((0, 0), (0, 0), (0, E_pad - E)))
        w_in = jnp.pad(w_t, ((0, E_pad - E), (0, E_pad - E)))
    else:
        x_in, posb_in, w_in = x, posb, w_t

    # Row tiles OUTER, batch INNER: the posb block index is constant over the
    # inner batch loop, so Pallas only re-DMAs it when the row tile changes.
    grid = (pl.cdiv(S, TM), B)

    vmem_limit = int(min(64 << 20,
                         max(32 << 20, vmem_estimate(TM) + (8 << 20))))

    out_p = pl.pallas_call(
        functools.partial(seblock_kernel, matmul_dtype=matmul_dtype),
        out_shape=jax.ShapeDtypeStruct((B, S, E_pad), x.dtype),
        grid_spec=pltpu.PrefetchScalarGridSpec(
            num_scalar_prefetch=0,
            grid=grid,
            in_specs=[
                pl.BlockSpec((1, TM, E_pad), lambda s, b: (b, s, 0)),   # x
                pl.BlockSpec((E_pad, E_pad), lambda s, b: (0, 0),       # weight
                             pipeline_mode=w_pipeline_mode),
                pl.BlockSpec((1, TM, E_pad), lambda s, b: (0, s, 0)),   # pos+bias
            ],
            out_specs=pl.BlockSpec((1, TM, E_pad), lambda s, b: (b, s, 0)),
        ),
        compiler_params=pltpu.CompilerParams(
            dimension_semantics=("parallel", "parallel"),
            vmem_limit_bytes=vmem_limit,
        ),
    )(x_in, w_in, posb_in)

    # Strip lane padding only if we added it (padded lanes gate to exactly 0).
    return out_p[:, :, :E] if E_pad != E else out_p


if __name__ == "__main__":
    # Small shapes consistent with the module: (B, n_patches, emb_size)
    B, S, E = 2, 8, 32
    key = jax.random.PRNGKey(0)
    kx, kw, kb, kp = jax.random.split(key, 4)

    x = jax.random.normal(kx, (B, S, E), dtype=jnp.float32)
    # Deterministic synthetic parameters (module init would be Linear default +
    # zero pos-emb; random values exercise every term of the forward).
    w_qkv = jax.random.normal(kw, (E, E), dtype=jnp.float32) * (1.0 / jnp.sqrt(E))
    b_qkv = jax.random.normal(kb, (E,), dtype=jnp.float32) * 0.1
    pos_emb = jax.random.normal(kp, (1, S, E), dtype=jnp.float32) * 0.02

    out = seblock_forward(x, w_qkv, b_qkv, pos_emb)
    out = jax.block_until_ready(out)

    # Pure-JAX reference of the same semantics.
    ref = x * (jnp.einsum("bse,oe->bso", x, w_qkv) + b_qkv + pos_emb)
    assert out.shape == ref.shape
    assert jnp.allclose(out, ref, atol=1e-3, rtol=1e-3), "mismatch vs reference"

    print("KERNEL_OK")
</pallas_src>

<mosaic_0001>
module attributes {stable_mosaic.version = 11 : i64} {
  func.func @seblock_kernel(%arg0: i32, %arg1: i32, %arg2: memref<1x8x128xf32, #tpu.memory_space<vmem>>, %arg3: memref<128x128xf32, #tpu.memory_space<vmem>>, %arg4: memref<1x8x128xf32, #tpu.memory_space<vmem>>, %arg5: memref<1x8x128xf32, #tpu.memory_space<vmem>>) attributes {dimension_semantics = [#tpu.dimension_semantics<parallel>, #tpu.dimension_semantics<parallel>], iteration_bounds = array<i64: 1, 2>, scalar_prefetch = 0 : i64, scratch_operands = 0 : i64, tpu.core_type = #tpu.core_type<tc>, window_params = [{transform_indices = @transform_0, window_bounds = array<i64: 1, 8, 128>}, {pipeline_mode = #tpu.pipeline_mode<synchronous>, transform_indices = @transform_1, window_bounds = array<i64: 128, 128>}, {transform_indices = @transform_2, window_bounds = array<i64: 1, 8, 128>}, {transform_indices = @transform_3, window_bounds = array<i64: 1, 8, 128>}]} {
    %c0 = arith.constant 0 : index
    %c0_0 = arith.constant 0 : index
    %c0_1 = arith.constant 0 : index
    %0 = vector.load %arg2[%c0, %c0_0, %c0_1] : memref<1x8x128xf32, #tpu.memory_space<vmem>>, vector<1x8x128xf32>
    %1 = vector.shape_cast %0 : vector<1x8x128xf32> to vector<8x128xf32>
    %c0_2 = arith.constant 0 : index
    %c0_3 = arith.constant 0 : index
    %2 = vector.load %arg3[%c0_2, %c0_3] : memref<128x128xf32, #tpu.memory_space<vmem>>, vector<128x128xf32>
    %cst = arith.constant dense<0.000000e+00> : vector<8x128xf32>
    %3 = tpu.matmul %1, %2, %cst {dimension_numbers = #tpu.dot_dimension_numbers<[1], [0], [0], [1], [0, 0, 1, 1], [], []>} : vector<8x128xf32>, vector<128x128xf32>, vector<8x128xf32> -> vector<8x128xf32>
    %c0_4 = arith.constant 0 : index
    %c0_5 = arith.constant 0 : index
    %c0_6 = arith.constant 0 : index
    %4 = vector.load %arg4[%c0_4, %c0_5, %c0_6] : memref<1x8x128xf32, #tpu.memory_space<vmem>>, vector<1x8x128xf32>
    %5 = vector.shape_cast %4 : vector<1x8x128xf32> to vector<8x128xf32>
    %6 = arith.addf %3, %5 : vector<8x128xf32>
    %7 = arith.mulf %1, %6 : vector<8x128xf32>
    %c0_7 = arith.constant 0 : index
    %c0_8 = arith.constant 0 : index
    %c0_9 = arith.constant 0 : index
    %8 = vector.load %arg5[%c0_7, %c0_8, %c0_9] : memref<1x8x128xf32, #tpu.memory_space<vmem>>, vector<1x8x128xf32>
    %9 = vector.shape_cast %8 : vector<1x8x128xf32> to vector<8x128xf32>
    %10 = vector.shape_cast %7 : vector<8x128xf32> to vector<1x8x128xf32>
    tpu.vector_store %arg5[%c0_7, %c0_8, %c0_9], %10 {strides = array<i32>} : memref<1x8x128xf32, #tpu.memory_space<vmem>>, vector<1x8x128xf32>,
    return
  }
  func.func @transform_0(%arg0: i32, %arg1: i32) -> (i32, i32, i32) {
    %c0_i32 = arith.constant 0 : i32
    %c0_i32_0 = arith.constant 0 : i32
    return %arg1, %arg0, %c0_i32 : i32, i32, i32
  }
  func.func @transform_1(%arg0: i32, %arg1: i32) -> (i32, i32) {
    %c0_i32 = arith.constant 0 : i32
    %c0_i32_0 = arith.constant 0 : i32
    %c0_i32_1 = arith.constant 0 : i32
    return %c0_i32, %c0_i32_0 : i32, i32
  }
  func.func @transform_2(%arg0: i32, %arg1: i32) -> (i32, i32, i32) {
    %c0_i32 = arith.constant 0 : i32
    %c0_i32_0 = arith.constant 0 : i32
    %c0_i32_1 = arith.constant 0 : i32
    return %c0_i32, %arg0, %c0_i32_0 : i32, i32, i32
  }
  func.func @transform_3(%arg0: i32, %arg1: i32) -> (i32, i32, i32) {
    %c0_i32 = arith.constant 0 : i32
    %c0_i32_0 = arith.constant 0 : i32
    return %arg1, %arg0, %c0_i32 : i32, i32, i32
  }
}

</mosaic_0001>

<bundles_post_ra>
// kernel: tpu_custom_call.1
= control target key start
LH: loop header
LB: loop body
LE: loop exit
PB: predicated region body
PF: predicated region fallthrough
CT: control target
= control target key end

     0   :  { %8 = vsyncpa [#allocation3], 0  ;;  %s1084_s0 = inlined_call_operand.hbm [shape: f32[2,8,128], index: 0, kind: input, shape index: {}]   ;;  %s1085_s1 = inlined_call_operand.hbm [shape: f32[128,128], index: 1, kind: input, shape index: {}]   ;;  %s1086_s2 = inlined_call_operand.hbm [shape: f32[1,8,128], index: 2, kind: input, shape index: {}]   ;;  %s1087_s3 = inlined_call_operand.hbm [shape: f32[2,8,128], index: 3, kind: output, shape index: {}]  }
   0x1   :  { %10 = vsyncpa [#allocation3 + $0x1], 0 }
   0x2   :  { %11 = vsyncpa [#allocation6], 0 }
   0x3   :  { %12 = vsyncpa [#allocation4], 0 }
   0x4   :  { %14 = vsyncpa [#allocation4 + $0x1], 0  ;;  %s827_s12 = smov 0   ;;  %s829_s13 = smov 0  }
   0x5   :  { %s831_s14 = smov 0   ;;  %s833_s15 = smov 0  }
   0x6   :  { %s835_s16 = smov 0   ;;  %s837_s17 = smov 0  }
   0x7 LB: > { %s443_s18 = sadd.s32 4294967295, %s796_s17   ;;  %s444_s19 = sadd.s32 4294967294, %s796_s17   ;;  %s796_s17 = sphi %s837_s17, %s20_s17   ;;  %s792_s16 = sphi %s835_s16, %s1109_s16   ;;  %s788_s15 = sphi %s833_s15, %s1108_s15   ;;  %s784_s14 = sphi %s831_s14, %s1107_s14   ;;  %s780_s13 = sphi %s829_s13, %s1106_s13   ;;  %s776_s12 = sphi %s827_s12, %s1105_s12  }
   0x8   : > { %p54_p0 = scmp.ne.s32.totalorder %s780_s13, %s776_s12  ;;  %p861_p1 = scmp.eq.s32.totalorder %s443_s18, 0 }
   0x9   : > { %p865_p2 = scmp.eq.s32.totalorder %s443_s18, 1  ;;  %p133_p3 = scmp.eq.s32.totalorder %s444_s19, 1 }
   0xa   : > { %s1092_s20 = scalar_select %p861_p1, 1, 0 }
   0xb   : > { %p871_p4 = por %p861_p1, %p54_p0  ;;  %p445_p5 = scmp.ge.s32.totalorder %s796_s17, 1 }
   0xc   : > { %p876_p6 = por %p133_p3, %p54_p0  ;;  %p140_p7 = scmp.lt.s32.totalorder %s796_s17, 3 }
   0xd   : > { %s1094_s22 = scalar_select %p871_p4, 1, 0 }
   0xe   : > { %s1095_s23 = scalar_select %p876_p6, 1, 0 }
   0xf   : > { %p881_p8 = pnand %p445_p5, %p140_p7  ;;  %s798_s25 = smov [#allocation5]  }
  0x10   : > { %s152_s26 = sshll.u32 %s798_s25, 4  ;;  %s799_s28 = smov [#allocation7]   ;;  %s885_s26 = int_to_ptr.vmem [resolvable:$true] %s152_s26 }
  0x11   : > { %p548_p9 = pneg %p881_p8  ;;  %s168_s29 = sshll.u32 %s799_s28, 4  ;;  %s896_s29 = int_to_ptr.vmem [resolvable:$true] %s168_s29 }
  0x12   : > { %s624_s5 = scalar_lea.hbm %s1085_s1, 2048 }
  0x13   : > { %p892_p11 = pnand %p548_p9, %p861_p1  ;;  %p625_p12 = scmp.ne.s32.totalorder %s1085_s1, %s624_s5 }
  0x14   : > { %p631_p5 = scmp.lt.u32.totalorder %s624_s5, %s1085_s1 }
  0x15   : > { %p626_p13 = pneg %p892_p11 }
  0x17   : > { %p627_p0 = pnand %p626_p13, %p625_p12 }
  0x19   : > { %p628_p3 = pneg %p627_p0 }
  0x1b   : > { %p633_p7 = pnand %p631_p5, %p628_p3 }
  0x1d   : > { %636 = shalt.err (!%p633_p7)
}
  0x1e   : > { %s637_s10 = scalar_lea.vmem %s885_s26, 2048  ;;  %p645_p1 = scmp.lt.s32.totalorder %s885_s26, %s885_s26 }
  0x1f   : > { %p638_p9 = scmp.ne.s32.totalorder %s885_s26, %s637_s10  ;;  %p646_p12 = scmp.lt.s32.totalorder %s637_s10, %s637_s10 }
  0x21   : > { %p640_p10 = pnand %p638_p9, %p626_p13  ;;  %p647_p0 = por %p646_p12, %p645_p1 }
  0x23   : > { %p641_p6 = pneg %p640_p10 }
  0x25   : > { %p648_p4 = pnand %p647_p0, %p641_p6 }
  0x27   : > { %651 = shalt.err (!%p648_p4)
}
  0x28   : > { %s800_s11 = smov 128   ;;  %s801_s18 = smov 8  }
  0x29   : > { %551 = dma.hbm_to_vmem [thread:$0]  (!%p892_p11), %s1085_s1, 2048, %s885_s26, [#allocation6], %s800_s11, %s800_s11, %s801_s18  }
  0x2a   : > { %s652_s4 = scalar_lea.hbm %s1086_s2, 128 }
  0x2b   : > { %p653_p1 = scmp.ne.s32.totalorder %s1086_s2, %s652_s4  ;;  %p659_p10 = scmp.lt.u32.totalorder %s652_s4, %s1086_s2 }
  0x2d   : > { %p655_p4 = pnand %p653_p1, %p626_p13 }
  0x2f   : > { %p656_p6 = pneg %p655_p4 }
  0x31   : > { %p661_p3 = pnand %p659_p10, %p656_p6 }
  0x33   : > { %664 = shalt.err (!%p661_p3)
}
  0x34   : > { %s665_s26 = scalar_lea.vmem %s896_s29, 128  ;;  %p673_p12 = scmp.lt.s32.totalorder %s896_s29, %s896_s29 }
  0x35   : > { %p666_p5 = scmp.ne.s32.totalorder %s896_s29, %s665_s26  ;;  %p674_p0 = scmp.lt.s32.totalorder %s665_s26, %s665_s26 }
  0x37   : > { %p668_p7 = pnand %p666_p5, %p626_p13  ;;  %p675_p1 = por %p674_p0, %p673_p12 }
  0x39   : > { %p669_p9 = pneg %p668_p7 }
  0x3b   : > { %p676_p4 = pnand %p675_p1, %p669_p9 }
  0x3d   : > { %679 = shalt.err (!%p676_p4)
}
  0x3e   : > { %554 = dma.hbm_to_vmem [thread:$0]  (!%p892_p11), %s1086_s2, 128, %s896_s29, [#allocation6]  }
  0x3f   : > { %s29_s11 = sadd.s32 1, %s792_s16  ;;  %s41_s18 = sadd.s32 1, %s784_s14 }
  0x40   : > { %p30_p13 = scmp.ge.s32.totalorder %s29_s11, 2  ;;  %p48_p6 = scmp.ne.s32.totalorder %s784_s14, %s780_s13 }
  0x41   : > { %p49_p10 = scmp.eq.s32.totalorder %s796_s17, 0  ;;  %p565_p3 = scmp.lt.s32.totalorder %s796_s17, 2 }
  0x42   : > { %s1111_s11 = smov (%p30_p13, %s29_s11), 0  ;;  %p960_p7 = por %p865_p2, %p48_p6 }
  0x43   : > { %p50_p5 = por %p49_p10, %p48_p6  ;;  %s36_s19 = ssub.s32 %s792_s16, %s1111_s11 }
  0x44   : > { %s1098_s27 = scalar_select %p960_p7, 1, 0 }
  0x45   : > { %s179_s25 = sand.u32 1, %s784_s14   ;;  %p39_p9 = scmp.eq.s32.totalorder %s36_s19, 0 }
  0x46   : > { %s449_s29 = sshll.u32 %s179_s25, 3  ;;  %s450_s28 = sshll.u32 %s792_s16, 7 }
  0x47   : > { %s969_s30 = scalar_select %p39_p9, %s784_s14, %s41_s18  }
  0x48   : > { %s974_s6 = scalar_lea.hbm %s1084_s0, %s450_s28  ;;  %s183_s21 = scalar_lea.vmem [#allocation2], %s449_s29 }
  0x49   : > { %s191_s7 = sshll.u32 %s183_s21, 4  ;;  %p978_p2 = pnand %p565_p3, %p50_p5  ;;  %s982_s7 = int_to_ptr.vmem [resolvable:$true] %s191_s7 }
  0x4a   : > { %s180_s26 = scalar_lea.sflag [#allocation3], %s179_s25  ;;  %s680_s9 = scalar_lea.hbm %s974_s6, 128 }
  0x4b   : > { %p681_p11 = scmp.ne.s32.totalorder %s974_s6, %s680_s9  ;;  %p682_p12 = pneg %p978_p2 }
  0x4c   : > { %s685_s19 = scalar_lea.hbm %s1084_s0, 256  ;;  %p686_p4 = scmp.lt.u32.totalorder %s974_s6, %s1084_s0 }
  0x4d   : > { %p683_p0 = pnand %p682_p12, %p681_p11  ;;  %p687_p13 = scmp.lt.u32.totalorder %s685_s19, %s680_s9 }
  0x4e   : > { %p689_p10 = scmp.lt.u32.totalorder %s680_s9, %s974_s6 }
  0x4f   : > { %p684_p1 = pneg %p683_p0  ;;  %p688_p6 = por %p687_p13, %p686_p4 }
  0x51   : > { %p690_p3 = por %p689_p10, %p688_p6 }
  0x53   : > { %p691_p5 = pnand %p690_p3, %p684_p1 }
  0x55   : > { %694 = shalt.err (!%p691_p5)
}
  0x56   : > { %s695_s25 = scalar_lea.vmem %s982_s7, 128  ;;  %s802_s4 = smov [#allocation2]  }
  0x57   : > { %p696_p9 = scmp.ne.s32.totalorder %s982_s7, %s695_s25  ;;  %s700_s5 = sshll.u32 %s802_s4, 4  ;;  %s701_s5 = int_to_ptr.vmem [resolvable:$false] %s700_s5 }
  0x58   : > { %s702_s21 = scalar_lea.vmem %s701_s5, 256  ;;  %p703_p7 = scmp.lt.s32.totalorder %s982_s7, %s701_s5 }
  0x59   : > { %p698_p11 = pnand %p696_p9, %p682_p12  ;;  %p704_p4 = scmp.lt.s32.totalorder %s702_s21, %s695_s25 }
  0x5b   : > { %p699_p0 = pneg %p698_p11  ;;  %p705_p13 = por %p704_p4, %p703_p7 }
  0x5d   : > { %p706_p6 = pnand %p705_p13, %p699_p0 }
  0x5f   : > { %709 = shalt.err (!%p706_p6)
}
  0x60   : > { %558 = dma.hbm_to_vmem [thread:$0]  (!%p978_p2), %s974_s6, 128, %s982_s7, %s180_s26  }
  0x61   : > { %200 = sbr.rel (%p881_p8) target bundleno = 373 (0x175), region = 32  ;;  %s1012_s9 = sand.u32 (!%p881_p8), 1, %s780_s13  }
  0x62   : > { %s452_s10 = sshll.u32 (!%p881_p8), %s1012_s9, 3  ;;  %s203_s18 = scalar_lea.sflag (!%p881_p8), [#allocation3], %s1012_s9 }
  0x63   : > { %s1018_s19 = scalar_lea.vmem (!%p881_p8), [#allocation2], %s452_s10  ;;  %p1100_p7 = scmp.ne.s32.totalorder (!%p881_p8), %s1094_s22, 0 }
  0x68   : > { %763 = dma.done.wait (%p1100_p7), %s203_s18, 128  }
  0x69   : > { %765 = vsyncadd (%p1100_p7), %s203_s18, 4294967168  ;;  %p1101_p2 = scmp.ne.s32.totalorder %s1092_s20, 0 }
  0x6b   : > { %767 = dma.done.wait (%p1101_p2), [#allocation6], 2176  }
  0x6c   : > { %769 = vsyncadd (%p1101_p2), [#allocation6], 4294965120  ;;  %v803_v0 = vmov 0.0|0.0   ;;  %vm804_vm0 = vmmov 0   ;;  %v805_v1 = vmov 0.0   ;;  %v238_v2 = vld [vmem:[#allocation5] sm:$0xff] }
  0x6d   : > { %512 = vmatprep.subr.bf16.mxu0 %v803_v0  ;;  %509 = vmatprep.mubr.msk.f32.mxu0 %vm804_vm0, %v805_v1  ;;  %v239_v3 = vld [vmem:[#allocation5 + $0x8] sm:$0xff]  ;;  %v240_v4 = vld [vmem:[#allocation5 + $0x10] sm:$0xff]  ;;  %v241_v6 = vld [vmem:[#allocation5 + $0x18] sm:$0xff]  ;;  %s457_s20 = sshll.u32 %s788_s15, 7  ;;  %s236_s22 = scalar_lea.vmem [#allocation8], %s452_s10 }
  0x6e   : > { %v513_v5 = vpack.c.bf16 %v239_v3, %v238_v2  ;;  %v516_v7 = vpack.c.bf16 %v241_v6, %v240_v4  ;;  %v242_v8 = vld [vmem:[#allocation5 + $0x20] sm:$0xff]  ;;  %v243_v9 = vld [vmem:[#allocation5 + $0x28] sm:$0xff]  ;;  %v244_v11 = vld [vmem:[#allocation5 + $0x30] sm:$0xff]  ;;  %s342_s24 = sshll.u32 %s236_s22, 4  ;;  %s1035_s8 = scalar_lea.hbm %s1087_s3, %s457_s20  ;;  %s1037_s24 = int_to_ptr.vmem [resolvable:$true] %s342_s24 }
  0x6f   : > { %v519_v10 = vpack.c.bf16 %v243_v9, %v242_v8  ;;  %v245_v12 = vld [vmem:[#allocation5 + $0x38] sm:$0xff]  ;;  %v246_v14 = vld [vmem:[#allocation5 + $0x40] sm:$0xff]  ;;  %v247_v15 = vld [vmem:[#allocation5 + $0x48] sm:$0xff]  ;;  %s328_s26 = scalar_lea.sflag [#allocation4], %s1012_s9  ;;  %s710_s29 = scalar_lea.vmem %s1037_s24, 128 }
  0x70   : > { %514 = vmatpush3.bf16.msra.mxu0 %v513_v5  ;;  %v522_v13 = vpack.c.bf16 %v245_v12, %v244_v11  ;;  %v525_v16 = vpack.c.bf16 %v247_v15, %v246_v14  ;;  %v248_v17 = vld [vmem:[#allocation5 + $0x50] sm:$0xff]  ;;  %v249_v18 = vld [vmem:[#allocation5 + $0x58] sm:$0xff]  ;;  %v250_v20 = vld [vmem:[#allocation5 + $0x60] sm:$0xff]  ;;  %p711_p8 = scmp.ne.s32.totalorder %s1037_s24, %s710_s29  ;;  %p1102_p12 = scmp.ne.s32.totalorder %s1098_s27, 0 }
  0x71   : > { %515 = vmatprep.subr.bf16.mxu0 %v803_v0  ;;  %v528_v19 = vpack.c.bf16 %v249_v18, %v248_v17  ;;  %v251_v21 = vld [vmem:[#allocation5 + $0x68] sm:$0xff]  ;;  %v252_v23 = vld [vmem:[#allocation5 + $0x70] sm:$0xff]  ;;  %v253_v24 = vld [vmem:[#allocation5 + $0x78] sm:$0xff]  ;;  %s806_s15 = smov [#allocation8]  }
  0x72   : > { %v531_v22 = vpack.c.bf16 %v251_v21, %v250_v20  ;;  %v534_v25 = vpack.c.bf16 %v253_v24, %v252_v23  ;;  %v237_v26 = vld [vmem:[%s1018_s19] sm:$0xff]  ;;  %v254_v27 = vld [vmem:[#allocation7] sm:$0xff]  ;;  %p712_p1 = pnand %p711_p8, %p1102_p12  ;;  %s714_s28 = sshll.u32 %s806_s15, 4  ;;  %s715_s28 = int_to_ptr.vmem [resolvable:$false] %s714_s28 }
  0x73   : > { %s716_s25 = scalar_lea.vmem %s715_s28, 256  ;;  %p717_p3 = scmp.lt.s32.totalorder %s1037_s24, %s715_s28 }
  0x74   : > { %517 = vmatpush3.bf16.msra.mxu0 %v516_v7  ;;  %p713_p10 = pneg %p712_p1  ;;  %p718_p5 = scmp.lt.s32.totalorder %s716_s25, %s710_s29 }
  0x75   : > { %518 = vmatprep.subr.bf16.mxu0 %v803_v0 }
  0x76   : > { %p719_p9 = por %p718_p5, %p717_p3 }
  0x78   : > { %520 = vmatpush3.bf16.msra.mxu0 %v519_v10  ;;  %p720_p11 = pnand %p719_p9, %p713_p10 }
  0x79   : > { %521 = vmatprep.subr.bf16.mxu0 %v803_v0 }
  0x7c   : > { %523 = vmatpush3.bf16.msra.mxu0 %v522_v13 }
  0x7d   : > { %524 = vmatprep.subr.bf16.mxu0 %v803_v0 }
  0x80   : > { %526 = vmatpush3.bf16.msra.mxu0 %v525_v16 }
  0x81   : > { %527 = vmatprep.subr.bf16.mxu0 %v803_v0 }
  0x84   : > { %529 = vmatpush3.bf16.msra.mxu0 %v528_v19 }
  0x85   : > { %530 = vmatprep.subr.bf16.mxu0 %v803_v0 }
  0x88   : > { %532 = vmatpush3.bf16.msra.mxu0 %v531_v22 }
  0x89   : > { %533 = vmatprep.subr.bf16.mxu0 %v803_v0 }
  0x8c   : > { %535 = vmatpush3.bf16.msra.mxu0 %v534_v25 }
  0x8f   : > { %510 = vmatmul.mubr.f32.vlgmr.msra.gmra.mrb[0].mxu0 %v237_v26 }
 0x162   : > { %v321_v28 = vpop.f32.mrb[0].mxu0 }
 0x163   : > { %v322_v29 = vadd.f32 %v321_v28, %v254_v27  ;;  %v511_v30 = vpop.f32.mrb[1].mxu0 }
 0x165   : > { %v325_v31 = vmul.f32 %v322_v29, %v237_v26 }
 0x167   : > { %326 = vst [vmem:[%s236_s22] sm:$0xff] %v325_v31 }
 0x168   : > { %723 = shalt.err (!%p720_p11)
}
 0x169   : > { %s724_s4 = scalar_lea.hbm %s1035_s8, 128  ;;  %s728_s9 = scalar_lea.hbm %s1087_s3, 256 }
 0x16a   : > { %p725_p0 = scmp.ne.s32.totalorder %s1035_s8, %s724_s4  ;;  %p729_p6 = scmp.lt.u32.totalorder %s1035_s8, %s1087_s3 }
 0x16b   : > { %p730_p7 = scmp.lt.u32.totalorder %s728_s9, %s724_s4  ;;  %p732_p8 = scmp.lt.u32.totalorder %s724_s4, %s1035_s8 }
 0x16c   : > { %p726_p4 = pnand %p725_p0, %p1102_p12 }
 0x16d   : > { %p731_p2 = por %p730_p7, %p729_p6 }
 0x16e   : > { %p727_p13 = pneg %p726_p4 }
 0x16f   : > { %p733_p1 = por %p732_p8, %p731_p2 }
 0x171   : > { %p734_p10 = pnand %p733_p1, %p727_p13 }
 0x173   : > { %737 = shalt.err (!%p734_p10)
}
 0x174   : > { %546 = dma.vmem_to_hbm [thread:$0]  (%p1102_p12), %s1037_s24, 128, %s1035_s8, %s328_s26  }
 0x175 PF: > { %s354_s19 = sand.u32 1, %s776_s12   ;;  %p1103_p3 = scmp.ne.s32.totalorder %s1095_s23, 0 }
 0x176   : > { %p1104_p5 = scmp.ge.s32.totalorder %s796_s17, 2  ;;  %s355_s20 = scalar_lea.sflag [#allocation4], %s354_s19 }
 0x178   : > { %p560_p9 = pnand %p1104_p5, %p1103_p3 }
 0x17a   : > { %771 = dma.done.wait (!%p560_p9), %s355_s20, 128  }
 0x17b   : > { %773 = vsyncadd (!%p560_p9), %s355_s20, 4294967168  ;;  %s20_s17 = sadd.s32 1, %s796_s17   ;;  %s1105_s12 = smov %s780_s13 }
 0x17c   : > { %p17_p11 = scmp.ge.s32.totalorder %s20_s17, 4   ;;  %s1106_s13 = smov %s784_s14 }
 0x17d   : > { %s1107_s14 = smov %s969_s30  ;;  %s1108_s15 = smov %s792_s16 }
 0x17e   : > { %s1109_s16 = smov %s1111_s11  ;;  %19 = sbr.rel (!%p17_p11) target bundleno = 7 (0x7), region = 86 }
 0x185   :  { %360 = vsyncpa [#allocation3], 1 }
 0x186   :  { %362 = vsyncpa [#allocation3 + $0x1], 1 }
 0x187   :  { %363 = vsyncpa [#allocation6], 1 }
 0x188   :  { %364 = vsyncpa [#allocation4], 1 }
 0x189   :  { %366 = vsyncpa [#allocation4 + $0x1], 1 }

</bundles_post_ra>
